<compile_context>
chip_gen: v5e
topology: v5e:2x2
jax: 0.10.0
libtpu: 0.0.40
codegen_flags: <defaults>
</compile_context>

<pallas_src>
import jax
import jax.numpy as jnp
from jax.experimental import pallas as pl
from jax.experimental.pallas import tpu as pltpu


def linear_kernel(w_ref, b_ref, xt_ref, o_ref):
    # w_ref: (2,) f32 in SMEM, b_ref: (1,) f32 in SMEM
    # xt_ref: (2, R, 128) f32 in VMEM  (batch on sublane*lane axes)
    # o_ref:  (R, 128)    f32 in VMEM
    w0 = w_ref[0]
    w1 = w_ref[1]
    b = b_ref[0]
    x0 = xt_ref[0]          # (R, 128)
    x1 = xt_ref[1]          # (R, 128)
    # Pure VPU multiply-adds; no MXU pass for a K=2, N=1 contraction.
    o_ref[...] = x0 * w0 + x1 * w1 + b


def linear_pallas(x, weight, bias, *, max_tb=512 * 1024, force_pallas=False):
    """y = x @ weight.T + bias with x: (B, 2), weight: (1, 2), bias: (1,)."""
    B, IN = x.shape
    OUT, IN_w = weight.shape
    assert IN == IN_w == 2 and OUT == 1
    assert x.dtype == jnp.float32, "kernel assumes f32 inputs"

    w_flat = weight.reshape(IN).astype(jnp.float32)   # (2,) -> SMEM scalars
    b_flat = bias.reshape(OUT).astype(jnp.float32)    # (1,) -> SMEM scalar

    # Small-batch fast path: one fused XLA op beats the transpose/pad/kernel/
    # slice pipeline when there is only nanoseconds of actual work.
    if not force_pallas and B <= 1024:
        return x @ w_flat.reshape(OUT, IN).T + b_flat

    LANE, SUB = 128, 8
    nblk = pl.cdiv(B, LANE)                               # 128-lane batch blocks
    max_blk = max(SUB, (max_tb // LANE) // SUB * SUB)     # blocks per grid step
    if nblk <= SUB and nblk <= max_blk:
        tgt_blk = nblk                                    # single block == full array
    else:
        half = pl.cdiv(nblk, 2)                           # >= 2 grid steps (v7x: 2 TCs)
        tgt_blk = min(max_blk, pl.cdiv(half, SUB) * SUB)  # multiple of 8 sublanes
    grid = pl.cdiv(nblk, tgt_blk)
    nblk_pad = grid * tgt_blk
    B_pad = nblk_pad * LANE

    # Transpose so batch maps to the lane axis; pad fuses into the same XLA
    # copy. The following reshape to (2, nblk_pad, 128) is free (contiguous).
    xt = x.T                                              # (2, B)
    if B_pad != B:
        xt = jnp.pad(xt, ((0, 0), (0, B_pad - B)))
    xt3 = xt.reshape(IN, nblk_pad, LANE)

    out = pl.pallas_call(
        linear_kernel,
        out_shape=jax.ShapeDtypeStruct((nblk_pad, LANE), jnp.float32),
        grid=(grid,),
        in_specs=[
            pl.BlockSpec(memory_space=pltpu.MemorySpace.SMEM),    # weight (2,)
            pl.BlockSpec(memory_space=pltpu.MemorySpace.SMEM),    # bias (1,)
            pl.BlockSpec((IN, tgt_blk, LANE), lambda i: (0, i, 0)),
        ],
        out_specs=pl.BlockSpec((tgt_blk, LANE), lambda i: (i, 0)),
        compiler_params=pltpu.CompilerParams(
            dimension_semantics=("parallel",),
            vmem_limit_bytes=32 * 1024 * 1024,
        ),
    )(w_flat, b_flat, xt3)

    # Strip batch padding; return (B, 1) matching nn.Linear output layout.
    return out.reshape(B_pad)[:B].reshape(B, OUT)


if __name__ == "__main__":
    key = jax.random.PRNGKey(0)
    kx, kw, kb, kx2, kx3 = jax.random.split(key, 5)

    IN, OUT = 2, 1
    # Deterministic parameter init mimicking nn.Linear: U(-1/sqrt(in), 1/sqrt(in))
    bound = 1.0 / jnp.sqrt(jnp.float32(IN))
    weight = jax.random.uniform(kw, (OUT, IN), jnp.float32, -bound, bound)
    bias = jax.random.uniform(kb, (OUT,), jnp.float32, -bound, bound)

    def check(x, **kwargs):
        y = linear_pallas(x, weight, bias, **kwargs)
        jax.block_until_ready(y)
        y_ref = x @ weight.T + bias
        assert y.shape == y_ref.shape
        assert jnp.allclose(y, y_ref, atol=1e-5), "mismatch vs reference"
        return y

    # 1) Module's natural shape (B=8): dispatches to the fused jnp fast path.
    x_small = jax.random.normal(kx, (8, IN), jnp.float32)
    check(x_small)

    # 2) Same small shape forced through the Pallas kernel (single-block grid).
    check(x_small, force_pallas=True)

    # 3) Non-multiple-of-128 batch with small tiles: multi-block grid + padding.
    x_mid = jax.random.normal(kx2, (2500, IN), jnp.float32)
    check(x_mid, force_pallas=True, max_tb=1024)

    # 4) Moderate batch: exercises the >=2-grid-step split (v7x megacore path).
    x_big = jax.random.normal(kx3, (4096, IN), jnp.float32)
    check(x_big, force_pallas=True)

    print("KERNEL_OK")
</pallas_src>

<mosaic_0001>
module attributes {stable_mosaic.version = 11 : i64} {
  func.func @linear_kernel(%arg0: i32, %arg1: memref<2xf32, #tpu.memory_space<smem>>, %arg2: memref<1xf32, #tpu.memory_space<smem>>, %arg3: memref<2x1x128xf32, #tpu.memory_space<vmem>>, %arg4: memref<1x128xf32, #tpu.memory_space<vmem>>) attributes {dimension_semantics = [#tpu.dimension_semantics<parallel>], iteration_bounds = array<i64: 1>, scalar_prefetch = 0 : i64, scratch_operands = 0 : i64, tpu.core_type = #tpu.core_type<tc>, window_params = [{transform_indices = @transform_0, window_bounds = array<i64: 2>}, {transform_indices = @transform_1, window_bounds = array<i64: 1>}, {transform_indices = @transform_2, window_bounds = array<i64: 2, 1, 128>}, {transform_indices = @transform_3, window_bounds = array<i64: 1, 128>}]} {
    %c0 = arith.constant 0 : index
    %0 = memref.load %arg1[%c0] : memref<2xf32, #tpu.memory_space<smem>>
    %c1 = arith.constant 1 : index
    %1 = memref.load %arg1[%c1] : memref<2xf32, #tpu.memory_space<smem>>
    %c0_0 = arith.constant 0 : index
    %2 = memref.load %arg2[%c0_0] : memref<1xf32, #tpu.memory_space<smem>>
    %c0_1 = arith.constant 0 : index
    %c0_2 = arith.constant 0 : index
    %c0_3 = arith.constant 0 : index
    %3 = vector.load %arg3[%c0_1, %c0_2, %c0_3] : memref<2x1x128xf32, #tpu.memory_space<vmem>>, vector<1x1x128xf32>
    %4 = vector.shape_cast %3 : vector<1x1x128xf32> to vector<1x128xf32>
    %c1_4 = arith.constant 1 : index
    %c0_5 = arith.constant 0 : index
    %c0_6 = arith.constant 0 : index
    %5 = vector.load %arg3[%c1_4, %c0_5, %c0_6] : memref<2x1x128xf32, #tpu.memory_space<vmem>>, vector<1x1x128xf32>
    %6 = vector.shape_cast %5 : vector<1x1x128xf32> to vector<1x128xf32>
    %7 = vector.broadcast %0 : f32 to vector<1x128xf32>
    %8 = arith.mulf %4, %7 : vector<1x128xf32>
    %9 = vector.broadcast %1 : f32 to vector<1x128xf32>
    %10 = arith.mulf %6, %9 : vector<1x128xf32>
    %11 = arith.addf %8, %10 : vector<1x128xf32>
    %12 = vector.broadcast %2 : f32 to vector<1x128xf32>
    %13 = arith.addf %11, %12 : vector<1x128xf32>
    %c0_7 = arith.constant 0 : index
    %c0_8 = arith.constant 0 : index
    %14 = vector.load %arg4[%c0_7, %c0_8] : memref<1x128xf32, #tpu.memory_space<vmem>>, vector<1x128xf32>
    tpu.vector_store %arg4[%c0_7, %c0_8], %13 {strides = array<i32>} : memref<1x128xf32, #tpu.memory_space<vmem>>, vector<1x128xf32>,
    return
  }
  func.func @transform_0(%arg0: i32) -> i32 {
    %c0_i32 = arith.constant 0 : i32
    %c0_i32_0 = arith.constant 0 : i32
    return %c0_i32 : i32
  }
  func.func @transform_1(%arg0: i32) -> i32 {
    %c0_i32 = arith.constant 0 : i32
    %c0_i32_0 = arith.constant 0 : i32
    return %c0_i32 : i32
  }
  func.func @transform_2(%arg0: i32) -> (i32, i32, i32) {
    %c0_i32 = arith.constant 0 : i32
    %c0_i32_0 = arith.constant 0 : i32
    %c0_i32_1 = arith.constant 0 : i32
    return %c0_i32, %arg0, %c0_i32_0 : i32, i32, i32
  }
  func.func @transform_3(%arg0: i32) -> (i32, i32) {
    %c0_i32 = arith.constant 0 : i32
    %c0_i32_0 = arith.constant 0 : i32
    return %arg0, %c0_i32 : i32, i32
  }
}

</mosaic_0001>

<bundles_post_ra>
// kernel: tpu_custom_call.1
= control target key start
LH: loop header
LB: loop body
LE: loop exit
PB: predicated region body
PF: predicated region fallthrough
CT: control target
= control target key end

     0   :  { %9 = vsyncpa [#allocation5], 0  ;;  %s141_s0 = inlined_call_operand.hbm [shape: f32[2], index: 0, kind: input, shape index: {}]   ;;  %s142_s1 = inlined_call_operand.<no memory space> [shape: f32[1], index: 1, kind: input, shape index: {}]   ;;  %s143_s2 = inlined_call_operand.vmem [shape: f32[2,1,128], index: 2, kind: input, shape index: {}]   ;;  %s144_s3 = inlined_call_operand.hbm [shape: f32[1,128], index: 3, kind: output, shape index: {}]  }
   0x1   :  { %10 = vsyncpa [#allocation4], 0  ;;  %s16_s14 = sshll.u32 %s141_s0, 4  ;;  %s104_s15 = smov [#allocation3]   ;;  %s17_s14 = int_to_ptr.hbm [resolvable:$true] %s16_s14 }
   0x2   :  { %19 = dma.hbm_to_smem %s17_s14, 16, %s104_s15, [#allocation5]  }
   0x3   :  { %100 = dma.done.wait [#allocation5], 16  }
   0x4   :  { %101 = vsyncadd [#allocation5], 4294967280 }
   0x5   :  { %28 = sfence }
   0x6   :  { %s29_s16 = sld [smem:[#allocation3]]  ;;  %v32_v0 = vld [vmem:[%s143_s2] sm:$0x1]  ;;  %v61_v1 = vld [vmem:[%s143_s2 + $0x1] sm:$0x1]  ;;  %v40_v6 = vstv %s142_s1  ;;  %s105_s23 = smov [#allocation6]  }
   0x7   :  { %s60_s17 = sld [smem:[#allocation3 + $0x1]]  ;;  %s48_s24 = sshll.u32 %s105_s23, 4  ;;  %s49_s24 = int_to_ptr.vmem [resolvable:$true] %s48_s24 }
   0x8   :  { %s50_s27 = sshll.u32 %s144_s3, 4  ;;  %s51_s27 = int_to_ptr.hbm [resolvable:$true] %s50_s27 }
   0xc   :  { %v35_v2 = vstv %s29_s16 }
   0xd   :  { %v36_v3 = vmul.f32 %v35_v2, %v32_v0  ;;  %v37_v4 = vstv %s60_s17 }
   0xe   :  { %v38_v5 = vmul.f32 %v61_v1, %v37_v4 }
  0x10   :  { %v39_v7 = vadd.f32 %v38_v5, %v36_v3 }
  0x12   :  { %v41_v8 = vadd.f32 %v40_v6, %v39_v7 }
  0x14   :  { %42 = vst [vmem:[#allocation6] sm:$0x1] %v41_v8 }
  0x15   :  { %53 = dma.vmem_to_hbm [thread:$0]  %s49_s24, 16, %s51_s27, [#allocation4]  }
  0x16   :  { %102 = dma.done.wait [#allocation4], 16  }
  0x17   :  { %103 = vsyncadd [#allocation4], 4294967280 }
  0x18   :  { %58 = vsyncpa [#allocation4], 1 }
  0x19   :  { %59 = vsyncpa [#allocation5], 1 }

</bundles_post_ra>
